<compile_context>
chip_gen: v6e
topology: v6e:2x2x1
jax: 0.10.0
libtpu: 0.0.40
codegen_flags: <defaults>
</compile_context>

<pallas_src>
import functools

import numpy as np
import jax
import jax.numpy as jnp
from jax.experimental import pallas as pl
from jax.experimental.pallas import tpu as pltpu

# Module hyperparameters (deterministic "parameters" of the nn.Module).
ALPHA = 5.0
DELTA = 0.1
EPSILON = 2.220446049250313e-16
_LN2 = 0.6931471805599453


def _vmem_capacity_bytes():
    """Generation-aware VMEM query (v5e/v6e: 128 MiB, v7x: 64 MiB per core)."""
    try:
        return int(pltpu.get_tpu_info().vmem_capacity_bytes)
    except Exception:
        return 64 * 1024 * 1024  # conservative fallback (v7x per-core)


def _pick_tiling(bs, ll, in_itemsize, lane_is_batch):
    """Choose (tile_b, padded_bs, vmem_limit_bytes) from VMEM capacity."""
    vmem_cap = _vmem_capacity_bytes()
    # Scoped-VMEM request: half of physical, capped at 64 MiB.
    vmem_limit = min(vmem_cap // 2, 64 * 1024 * 1024)
    budget = vmem_limit // 2  # pipeline buffers + in-kernel f32 temporaries
    # 2 double-buffered input streams + ~10 live f32 temporaries per element.
    per_row = ll * (2 * in_itemsize + 10 * 4)
    tile_b = budget // max(per_row, 1)
    # Batch-tile granularity: 128 when the batch maps to lanes, 8 to sublanes.
    mult = 128 if lane_is_batch else 8
    cap = 2048 if lane_is_batch else 512
    tile_b = int(max(mult, min(tile_b, cap)))
    tile_b = (tile_b // mult) * mult
    bs_rounded = -(-bs // mult) * mult
    tile_b = min(tile_b, bs_rounded)
    num_tiles = -(-bs // tile_b)
    return tile_b, num_tiles * tile_b, vmem_limit


def _smoothi_ndcg_kernel(s_ref, label_ref, inv_idcg_ref, ndcg_ref, *,
                         K, alpha, delta, eps, inv_denom, list_axis):
    """One batch tile: K-step SmoothI soft top-K -> per-row NDCG."""
    s = s_ref[...].astype(jnp.float32)
    label = label_ref[...].astype(jnp.float32)

    # make_pos_by_subtraction (row min -> 0), with alpha folded in once:
    # reference computes B_ = (alpha * s) * prod, so hoisting alpha*s is exact.
    a_s = alpha * (s - jnp.min(s, axis=list_axis, keepdims=True))

    red_shape = list(s.shape)
    red_shape[list_axis] = 1
    # Fused DCG accumulation: no (tile_b, K) intermediate, no concat.
    dcg = jnp.full(tuple(red_shape), eps, dtype=jnp.float32)
    prod = None  # running soft-exclusion product (== ones at k == 0)
    for k in range(K):  # small static K -> fully unrolled
        b = a_s if prod is None else a_s * prod
        b = b - jnp.max(b, axis=list_axis, keepdims=True)
        e = jnp.exp(b)                                           # EUP
        approx = e / jnp.sum(e, axis=list_axis, keepdims=True)   # softmax
        rel = jnp.sum(label * approx, axis=list_axis, keepdims=True)
        # 2**rel as exp(rel*ln2) (EUP); inv_denom[k] is a baked-in constant.
        dcg = dcg + jnp.exp(rel * _LN2) * inv_denom[k]
        if k + 1 < K:
            # stop_grad branch of the reference is identity in the forward.
            step = 1.0 - approx - delta
            prod = step if prod is None else prod * step

    ndcg_ref[...] = dcg * inv_idcg_ref[...].astype(jnp.float32)


# TODO(synk): forward-only; a custom_vjp honoring the stop-gradient on `prod`
# is required before this can be used with jax.grad for training.
@functools.partial(jax.jit,
                   static_argnames=("K", "alpha", "delta", "eps", "return_loss"))
def listwise_smoothi_ndcgk_loss(s, label, *, K=10, alpha=ALPHA, delta=DELTA,
                                eps=EPSILON, return_loss=True):
    """Pallas implementation of ListwiseSmoothINDCGKLoss.forward."""
    bs, ll = s.shape
    K = min(int(K), ll)

    # Static DCG discount constants 1/log2(k+2), baked into the kernel.
    inv_denom = (1.0 / np.log2(np.arange(2.0, K + 2.0))).astype(np.float32)

    # Ideal DCG (score independent): descending label sort, top-K, per-row
    # 1/IDCG -> (bs, 1).  Plain JAX (sort has no cheap Pallas lowering).
    label_f32 = label.astype(jnp.float32)
    sorted_topk = -jnp.sort(-label_f32, axis=-1)[:, :K]
    idcg = jnp.sum(jnp.exp2(sorted_topk) * jnp.asarray(inv_denom),
                   axis=-1, keepdims=True) + eps
    inv_idcg = 1.0 / idcg

    lane_is_batch = ll < 128  # short lists: put the batch on the lane axis
    in_itemsize = jnp.dtype(s.dtype).itemsize + jnp.dtype(label.dtype).itemsize
    tile_b, bs_pad, vmem_limit = _pick_tiling(bs, ll, in_itemsize, lane_is_batch)
    num_tiles = bs_pad // tile_b
    pad = bs_pad - bs
    if pad:
        s = jnp.pad(s, ((0, pad), (0, 0)))
        label = jnp.pad(label, ((0, pad), (0, 0)))
        inv_idcg = jnp.pad(inv_idcg, ((0, pad), (0, 0)), constant_values=1.0)

    kernel = functools.partial(
        _smoothi_ndcg_kernel, K=K, alpha=float(alpha), delta=float(delta),
        eps=float(eps), inv_denom=tuple(float(x) for x in inv_denom),
        list_axis=0 if lane_is_batch else 1)

    cost = pl.CostEstimate(
        flops=int(7 * K * bs_pad * ll),
        transcendentals=int(K * bs_pad * (ll + 1)),
        bytes_accessed=int(bs_pad * ll * in_itemsize + 2 * bs_pad * 4))
    cparams = pltpu.CompilerParams(
        dimension_semantics=("parallel",),
        vmem_limit_bytes=int(vmem_limit))

    if lane_is_batch:
        # Wrapper-side layout plumbing: batch -> lanes, documents -> sublanes.
        ndcg = pl.pallas_call(
            kernel,
            out_shape=jax.ShapeDtypeStruct((1, bs_pad), jnp.float32),
            grid=(num_tiles,),
            in_specs=[
                pl.BlockSpec((ll, tile_b), lambda i: (0, i)),
                pl.BlockSpec((ll, tile_b), lambda i: (0, i)),
                pl.BlockSpec((1, tile_b), lambda i: (0, i)),
            ],
            out_specs=pl.BlockSpec((1, tile_b), lambda i: (0, i)),
            compiler_params=cparams,
            cost_estimate=cost,
        )(s.T, label.T, inv_idcg.T)
        ndcg_valid = ndcg[0, :bs]
    else:
        ndcg = pl.pallas_call(
            kernel,
            out_shape=jax.ShapeDtypeStruct((bs_pad, 1), jnp.float32),
            grid=(num_tiles,),
            in_specs=[
                pl.BlockSpec((tile_b, ll), lambda i: (i, 0)),
                pl.BlockSpec((tile_b, ll), lambda i: (i, 0)),
                pl.BlockSpec((tile_b, 1), lambda i: (i, 0)),
            ],
            out_specs=pl.BlockSpec((tile_b, 1), lambda i: (i, 0)),
            compiler_params=cparams,
            cost_estimate=cost,
        )(s, label, inv_idcg)
        ndcg_valid = ndcg[:bs, 0]

    ndcg_sum = jnp.sum(ndcg_valid)  # padded rows excluded
    if return_loss:
        return jnp.float32(bs) - ndcg_sum        # sum(1 - ndcg)
    return ndcg_sum


def _reference_loss(s, label, *, K=10, alpha=ALPHA, delta=DELTA, eps=EPSILON):
    """Pure-JAX reference mirroring the PyTorch forward (for verification)."""
    s = s.astype(jnp.float32)
    label = label.astype(jnp.float32)
    bs, ll = s.shape
    K = min(K, ll)
    s = s - jnp.min(s, axis=-1, keepdims=True)
    prod = jnp.ones_like(s)
    rel_k = []
    for _ in range(K):
        b = alpha * s * prod
        approx = jax.nn.softmax(b - jnp.max(b, axis=-1, keepdims=True), axis=-1)
        rel_k.append(jnp.sum(label * approx, axis=-1))
        prod = prod * jax.lax.stop_gradient(1.0 - approx - delta)
    rel_k = jnp.stack(rel_k, axis=-1)
    denom = jnp.log2(jnp.arange(2.0, K + 2.0))
    sorted_topk = -jnp.sort(-label, axis=-1)[:, :K]
    dcg = jnp.sum(jnp.power(2.0, rel_k) / denom, axis=-1) + eps
    idcg = jnp.sum(jnp.power(2.0, sorted_topk) / denom, axis=-1) + eps
    return jnp.sum(1.0 - dcg / idcg)


if __name__ == "__main__":
    key = jax.random.PRNGKey(0)
    k1, k2, k3, k4 = jax.random.split(key, 4)

    # Case 1: short lists (list_len < 128) -> batch-on-lanes (transposed) path.
    s1 = jax.random.normal(k1, (4, 16), dtype=jnp.float32)
    label1 = jax.random.randint(k2, (4, 16), 0, 4).astype(jnp.float32)
    loss1 = jax.block_until_ready(listwise_smoothi_ndcgk_loss(s1, label1, K=8))
    ref1 = jax.block_until_ready(_reference_loss(s1, label1, K=8))
    # f32 iterative softmax/exp cascade -> 1e-4 tolerance.
    if not jnp.allclose(loss1, ref1, rtol=1e-4, atol=1e-4):
        raise AssertionError(f"short-list kernel {loss1} != reference {ref1}")

    # Case 2: long lists (list_len >= 128) -> docs-on-lanes (row) path.
    s2 = jax.random.normal(k3, (8, 128), dtype=jnp.float32)
    label2 = jax.random.randint(k4, (8, 128), 0, 4).astype(jnp.float32)
    loss2 = jax.block_until_ready(listwise_smoothi_ndcgk_loss(s2, label2, K=10))
    ref2 = jax.block_until_ready(_reference_loss(s2, label2, K=10))
    if not jnp.allclose(loss2, ref2, rtol=1e-4, atol=1e-4):
        raise AssertionError(f"long-list kernel {loss2} != reference {ref2}")

    print("KERNEL_OK")
</pallas_src>

<mosaic_0001>
module attributes {stable_mosaic.version = 11 : i64} {
  func.func @_smoothi_ndcg_kernel(%arg0: i32, %arg1: memref<16x128xf32, #tpu.memory_space<vmem>>, %arg2: memref<16x128xf32, #tpu.memory_space<vmem>>, %arg3: memref<1x128xf32, #tpu.memory_space<vmem>>, %arg4: memref<1x128xf32, #tpu.memory_space<vmem>>) attributes {dimension_semantics = [#tpu.dimension_semantics<parallel>], iteration_bounds = array<i64: 1>, scalar_prefetch = 0 : i64, scratch_operands = 0 : i64, tpu.core_type = #tpu.core_type<tc>, window_params = [{transform_indices = @transform_0, window_bounds = array<i64: 16, 128>}, {transform_indices = @transform_1, window_bounds = array<i64: 16, 128>}, {transform_indices = @transform_2, window_bounds = array<i64: 1, 128>}, {transform_indices = @transform_3, window_bounds = array<i64: 1, 128>}]} {
    %c0 = arith.constant 0 : index
    %c0_0 = arith.constant 0 : index
    %0 = vector.load %arg1[%c0, %c0_0] : memref<16x128xf32, #tpu.memory_space<vmem>>, vector<16x128xf32>
    %c0_1 = arith.constant 0 : index
    %c0_2 = arith.constant 0 : index
    %1 = vector.load %arg2[%c0_1, %c0_2] : memref<16x128xf32, #tpu.memory_space<vmem>>, vector<16x128xf32>
    %cst = arith.constant dense<0x7F800000> : vector<128xf32>
    %2 = vector.multi_reduction <minimumf>, %0, %cst [0] : vector<16x128xf32> to vector<128xf32>
    %3 = vector.shape_cast %2 : vector<128xf32> to vector<1x128xf32>
    %4 = vector.broadcast %3 : vector<1x128xf32> to vector<16x128xf32>
    %5 = arith.subf %0, %4 : vector<16x128xf32>
    %cst_3 = arith.constant 5.000000e+00 : f32
    %6 = vector.broadcast %cst_3 : f32 to vector<16x128xf32>
    %7 = arith.mulf %6, %5 : vector<16x128xf32>
    %cst_4 = arith.constant 2.22044605E-16 : f32
    %8 = vector.broadcast %cst_4 : f32 to vector<1x128xf32>
    %cst_5 = arith.constant dense<0xFF800000> : vector<128xf32>
    %9 = vector.multi_reduction <maximumf>, %7, %cst_5 [0] : vector<16x128xf32> to vector<128xf32>
    %10 = vector.shape_cast %9 : vector<128xf32> to vector<1x128xf32>
    %11 = vector.broadcast %10 : vector<1x128xf32> to vector<16x128xf32>
    %12 = arith.subf %7, %11 : vector<16x128xf32>
    %13 = math.exp %12 : vector<16x128xf32>
    %cst_6 = arith.constant dense<0.000000e+00> : vector<128xf32>
    %14 = vector.multi_reduction <add>, %13, %cst_6 [0] : vector<16x128xf32> to vector<128xf32>
    %15 = vector.shape_cast %14 : vector<128xf32> to vector<1x128xf32>
    %16 = vector.broadcast %15 : vector<1x128xf32> to vector<16x128xf32>
    %17 = arith.divf %13, %16 : vector<16x128xf32>
    %18 = arith.mulf %1, %17 : vector<16x128xf32>
    %cst_7 = arith.constant dense<0.000000e+00> : vector<128xf32>
    %19 = vector.multi_reduction <add>, %18, %cst_7 [0] : vector<16x128xf32> to vector<128xf32>
    %20 = vector.shape_cast %19 : vector<128xf32> to vector<1x128xf32>
    %cst_8 = arith.constant 0.693147182 : f32
    %21 = vector.broadcast %cst_8 : f32 to vector<1x128xf32>
    %22 = arith.mulf %20, %21 : vector<1x128xf32>
    %23 = math.exp %22 : vector<1x128xf32>
    %cst_9 = arith.constant 1.000000e+00 : f32
    %24 = vector.broadcast %cst_9 : f32 to vector<1x128xf32>
    %25 = arith.mulf %23, %24 : vector<1x128xf32>
    %26 = arith.addf %8, %25 : vector<1x128xf32>
    %cst_10 = arith.constant 1.000000e+00 : f32
    %27 = vector.broadcast %cst_10 : f32 to vector<16x128xf32>
    %28 = arith.subf %27, %17 : vector<16x128xf32>
    %cst_11 = arith.constant 1.000000e-01 : f32
    %29 = vector.broadcast %cst_11 : f32 to vector<16x128xf32>
    %30 = arith.subf %28, %29 : vector<16x128xf32>
    %31 = arith.mulf %7, %30 : vector<16x128xf32>
    %cst_12 = arith.constant dense<0xFF800000> : vector<128xf32>
    %32 = vector.multi_reduction <maximumf>, %31, %cst_12 [0] : vector<16x128xf32> to vector<128xf32>
    %33 = vector.shape_cast %32 : vector<128xf32> to vector<1x128xf32>
    %34 = vector.broadcast %33 : vector<1x128xf32> to vector<16x128xf32>
    %35 = arith.subf %31, %34 : vector<16x128xf32>
    %36 = math.exp %35 : vector<16x128xf32>
    %cst_13 = arith.constant dense<0.000000e+00> : vector<128xf32>
    %37 = vector.multi_reduction <add>, %36, %cst_13 [0] : vector<16x128xf32> to vector<128xf32>
    %38 = vector.shape_cast %37 : vector<128xf32> to vector<1x128xf32>
    %39 = vector.broadcast %38 : vector<1x128xf32> to vector<16x128xf32>
    %40 = arith.divf %36, %39 : vector<16x128xf32>
    %41 = arith.mulf %1, %40 : vector<16x128xf32>
    %cst_14 = arith.constant dense<0.000000e+00> : vector<128xf32>
    %42 = vector.multi_reduction <add>, %41, %cst_14 [0] : vector<16x128xf32> to vector<128xf32>
    %43 = vector.shape_cast %42 : vector<128xf32> to vector<1x128xf32>
    %cst_15 = arith.constant 0.693147182 : f32
    %44 = vector.broadcast %cst_15 : f32 to vector<1x128xf32>
    %45 = arith.mulf %43, %44 : vector<1x128xf32>
    %46 = math.exp %45 : vector<1x128xf32>
    %cst_16 = arith.constant 0.630929768 : f32
    %47 = vector.broadcast %cst_16 : f32 to vector<1x128xf32>
    %48 = arith.mulf %46, %47 : vector<1x128xf32>
    %49 = arith.addf %26, %48 : vector<1x128xf32>
    %cst_17 = arith.constant 1.000000e+00 : f32
    %50 = vector.broadcast %cst_17 : f32 to vector<16x128xf32>
    %51 = arith.subf %50, %40 : vector<16x128xf32>
    %cst_18 = arith.constant 1.000000e-01 : f32
    %52 = vector.broadcast %cst_18 : f32 to vector<16x128xf32>
    %53 = arith.subf %51, %52 : vector<16x128xf32>
    %54 = arith.mulf %30, %53 : vector<16x128xf32>
    %55 = arith.mulf %7, %54 : vector<16x128xf32>
    %cst_19 = arith.constant dense<0xFF800000> : vector<128xf32>
    %56 = vector.multi_reduction <maximumf>, %55, %cst_19 [0] : vector<16x128xf32> to vector<128xf32>
    %57 = vector.shape_cast %56 : vector<128xf32> to vector<1x128xf32>
    %58 = vector.broadcast %57 : vector<1x128xf32> to vector<16x128xf32>
    %59 = arith.subf %55, %58 : vector<16x128xf32>
    %60 = math.exp %59 : vector<16x128xf32>
    %cst_20 = arith.constant dense<0.000000e+00> : vector<128xf32>
    %61 = vector.multi_reduction <add>, %60, %cst_20 [0] : vector<16x128xf32> to vector<128xf32>
    %62 = vector.shape_cast %61 : vector<128xf32> to vector<1x128xf32>
    %63 = vector.broadcast %62 : vector<1x128xf32> to vector<16x128xf32>
    %64 = arith.divf %60, %63 : vector<16x128xf32>
    %65 = arith.mulf %1, %64 : vector<16x128xf32>
    %cst_21 = arith.constant dense<0.000000e+00> : vector<128xf32>
    %66 = vector.multi_reduction <add>, %65, %cst_21 [0] : vector<16x128xf32> to vector<128xf32>
    %67 = vector.shape_cast %66 : vector<128xf32> to vector<1x128xf32>
    %cst_22 = arith.constant 0.693147182 : f32
    %68 = vector.broadcast %cst_22 : f32 to vector<1x128xf32>
    %69 = arith.mulf %67, %68 : vector<1x128xf32>
    %70 = math.exp %69 : vector<1x128xf32>
    %cst_23 = arith.constant 5.000000e-01 : f32
    %71 = vector.broadcast %cst_23 : f32 to vector<1x128xf32>
    %72 = arith.mulf %70, %71 : vector<1x128xf32>
    %73 = arith.addf %49, %72 : vector<1x128xf32>
    %cst_24 = arith.constant 1.000000e+00 : f32
    %74 = vector.broadcast %cst_24 : f32 to vector<16x128xf32>
    %75 = arith.subf %74, %64 : vector<16x128xf32>
    %cst_25 = arith.constant 1.000000e-01 : f32
    %76 = vector.broadcast %cst_25 : f32 to vector<16x128xf32>
    %77 = arith.subf %75, %76 : vector<16x128xf32>
    %78 = arith.mulf %54, %77 : vector<16x128xf32>
    %79 = arith.mulf %7, %78 : vector<16x128xf32>
    %cst_26 = arith.constant dense<0xFF800000> : vector<128xf32>
    %80 = vector.multi_reduction <maximumf>, %79, %cst_26 [0] : vector<16x128xf32> to vector<128xf32>
    %81 = vector.shape_cast %80 : vector<128xf32> to vector<1x128xf32>
    %82 = vector.broadcast %81 : vector<1x128xf32> to vector<16x128xf32>
    %83 = arith.subf %79, %82 : vector<16x128xf32>
    %84 = math.exp %83 : vector<16x128xf32>
    %cst_27 = arith.constant dense<0.000000e+00> : vector<128xf32>
    %85 = vector.multi_reduction <add>, %84, %cst_27 [0] : vector<16x128xf32> to vector<128xf32>
    %86 = vector.shape_cast %85 : vector<128xf32> to vector<1x128xf32>
    %87 = vector.broadcast %86 : vector<1x128xf32> to vector<16x128xf32>
    %88 = arith.divf %84, %87 : vector<16x128xf32>
    %89 = arith.mulf %1, %88 : vector<16x128xf32>
    %cst_28 = arith.constant dense<0.000000e+00> : vector<128xf32>
    %90 = vector.multi_reduction <add>, %89, %cst_28 [0] : vector<16x128xf32> to vector<128xf32>
    %91 = vector.shape_cast %90 : vector<128xf32> to vector<1x128xf32>
    %cst_29 = arith.constant 0.693147182 : f32
    %92 = vector.broadcast %cst_29 : f32 to vector<1x128xf32>
    %93 = arith.mulf %91, %92 : vector<1x128xf32>
    %94 = math.exp %93 : vector<1x128xf32>
    %cst_30 = arith.constant 0.43067655 : f32
    %95 = vector.broadcast %cst_30 : f32 to vector<1x128xf32>
    %96 = arith.mulf %94, %95 : vector<1x128xf32>
    %97 = arith.addf %73, %96 : vector<1x128xf32>
    %cst_31 = arith.constant 1.000000e+00 : f32
    %98 = vector.broadcast %cst_31 : f32 to vector<16x128xf32>
    %99 = arith.subf %98, %88 : vector<16x128xf32>
    %cst_32 = arith.constant 1.000000e-01 : f32
    %100 = vector.broadcast %cst_32 : f32 to vector<16x128xf32>
    %101 = arith.subf %99, %100 : vector<16x128xf32>
    %102 = arith.mulf %78, %101 : vector<16x128xf32>
    %103 = arith.mulf %7, %102 : vector<16x128xf32>
    %cst_33 = arith.constant dense<0xFF800000> : vector<128xf32>
    %104 = vector.multi_reduction <maximumf>, %103, %cst_33 [0] : vector<16x128xf32> to vector<128xf32>
    %105 = vector.shape_cast %104 : vector<128xf32> to vector<1x128xf32>
    %106 = vector.broadcast %105 : vector<1x128xf32> to vector<16x128xf32>
    %107 = arith.subf %103, %106 : vector<16x128xf32>
    %108 = math.exp %107 : vector<16x128xf32>
    %cst_34 = arith.constant dense<0.000000e+00> : vector<128xf32>
    %109 = vector.multi_reduction <add>, %108, %cst_34 [0] : vector<16x128xf32> to vector<128xf32>
    %110 = vector.shape_cast %109 : vector<128xf32> to vector<1x128xf32>
    %111 = vector.broadcast %110 : vector<1x128xf32> to vector<16x128xf32>
    %112 = arith.divf %108, %111 : vector<16x128xf32>
    %113 = arith.mulf %1, %112 : vector<16x128xf32>
    %cst_35 = arith.constant dense<0.000000e+00> : vector<128xf32>
    %114 = vector.multi_reduction <add>, %113, %cst_35 [0] : vector<16x128xf32> to vector<128xf32>
    %115 = vector.shape_cast %114 : vector<128xf32> to vector<1x128xf32>
    %cst_36 = arith.constant 0.693147182 : f32
    %116 = vector.broadcast %cst_36 : f32 to vector<1x128xf32>
    %117 = arith.mulf %115, %116 : vector<1x128xf32>
    %118 = math.exp %117 : vector<1x128xf32>
    %cst_37 = arith.constant 0.386852801 : f32
    %119 = vector.broadcast %cst_37 : f32 to vector<1x128xf32>
    %120 = arith.mulf %118, %119 : vector<1x128xf32>
    %121 = arith.addf %97, %120 : vector<1x128xf32>
    %cst_38 = arith.constant 1.000000e+00 : f32
    %122 = vector.broadcast %cst_38 : f32 to vector<16x128xf32>
    %123 = arith.subf %122, %112 : vector<16x128xf32>
    %cst_39 = arith.constant 1.000000e-01 : f32
    %124 = vector.broadcast %cst_39 : f32 to vector<16x128xf32>
    %125 = arith.subf %123, %124 : vector<16x128xf32>
    %126 = arith.mulf %102, %125 : vector<16x128xf32>
    %127 = arith.mulf %7, %126 : vector<16x128xf32>
    %cst_40 = arith.constant dense<0xFF800000> : vector<128xf32>
    %128 = vector.multi_reduction <maximumf>, %127, %cst_40 [0] : vector<16x128xf32> to vector<128xf32>
    %129 = vector.shape_cast %128 : vector<128xf32> to vector<1x128xf32>
    %130 = vector.broadcast %129 : vector<1x128xf32> to vector<16x128xf32>
    %131 = arith.subf %127, %130 : vector<16x128xf32>
    %132 = math.exp %131 : vector<16x128xf32>
    %cst_41 = arith.constant dense<0.000000e+00> : vector<128xf32>
    %133 = vector.multi_reduction <add>, %132, %cst_41 [0] : vector<16x128xf32> to vector<128xf32>
    %134 = vector.shape_cast %133 : vector<128xf32> to vector<1x128xf32>
    %135 = vector.broadcast %134 : vector<1x128xf32> to vector<16x128xf32>
    %136 = arith.divf %132, %135 : vector<16x128xf32>
    %137 = arith.mulf %1, %136 : vector<16x128xf32>
    %cst_42 = arith.constant dense<0.000000e+00> : vector<128xf32>
    %138 = vector.multi_reduction <add>, %137, %cst_42 [0] : vector<16x128xf32> to vector<128xf32>
    %139 = vector.shape_cast %138 : vector<128xf32> to vector<1x128xf32>
    %cst_43 = arith.constant 0.693147182 : f32
    %140 = vector.broadcast %cst_43 : f32 to vector<1x128xf32>
    %141 = arith.mulf %139, %140 : vector<1x128xf32>
    %142 = math.exp %141 : vector<1x128xf32>
    %cst_44 = arith.constant 0.356207192 : f32
    %143 = vector.broadcast %cst_44 : f32 to vector<1x128xf32>
    %144 = arith.mulf %142, %143 : vector<1x128xf32>
    %145 = arith.addf %121, %144 : vector<1x128xf32>
    %cst_45 = arith.constant 1.000000e+00 : f32
    %146 = vector.broadcast %cst_45 : f32 to vector<16x128xf32>
    %147 = arith.subf %146, %136 : vector<16x128xf32>
    %cst_46 = arith.constant 1.000000e-01 : f32
    %148 = vector.broadcast %cst_46 : f32 to vector<16x128xf32>
    %149 = arith.subf %147, %148 : vector<16x128xf32>
    %150 = arith.mulf %126, %149 : vector<16x128xf32>
    %151 = arith.mulf %7, %150 : vector<16x128xf32>
    %cst_47 = arith.constant dense<0xFF800000> : vector<128xf32>
    %152 = vector.multi_reduction <maximumf>, %151, %cst_47 [0] : vector<16x128xf32> to vector<128xf32>
    %153 = vector.shape_cast %152 : vector<128xf32> to vector<1x128xf32>
    %154 = vector.broadcast %153 : vector<1x128xf32> to vector<16x128xf32>
    %155 = arith.subf %151, %154 : vector<16x128xf32>
    %156 = math.exp %155 : vector<16x128xf32>
    %cst_48 = arith.constant dense<0.000000e+00> : vector<128xf32>
    %157 = vector.multi_reduction <add>, %156, %cst_48 [0] : vector<16x128xf32> to vector<128xf32>
    %158 = vector.shape_cast %157 : vector<128xf32> to vector<1x128xf32>
    %159 = vector.broadcast %158 : vector<1x128xf32> to vector<16x128xf32>
    %160 = arith.divf %156, %159 : vector<16x128xf32>
    %161 = arith.mulf %1, %160 : vector<16x128xf32>
    %cst_49 = arith.constant dense<0.000000e+00> : vector<128xf32>
    %162 = vector.multi_reduction <add>, %161, %cst_49 [0] : vector<16x128xf32> to vector<128xf32>
    %163 = vector.shape_cast %162 : vector<128xf32> to vector<1x128xf32>
    %cst_50 = arith.constant 0.693147182 : f32
    %164 = vector.broadcast %cst_50 : f32 to vector<1x128xf32>
    %165 = arith.mulf %163, %164 : vector<1x128xf32>
    %166 = math.exp %165 : vector<1x128xf32>
    %cst_51 = arith.constant 0.333333343 : f32
    %167 = vector.broadcast %cst_51 : f32 to vector<1x128xf32>
    %168 = arith.mulf %166, %167 : vector<1x128xf32>
    %169 = arith.addf %145, %168 : vector<1x128xf32>
    %cst_52 = arith.constant 1.000000e+00 : f32
    %170 = vector.broadcast %cst_52 : f32 to vector<16x128xf32>
    %171 = arith.subf %170, %160 : vector<16x128xf32>
    %cst_53 = arith.constant 1.000000e-01 : f32
    %172 = vector.broadcast %cst_53 : f32 to vector<16x128xf32>
    %173 = arith.subf %171, %172 : vector<16x128xf32>
    %174 = arith.mulf %150, %173 : vector<16x128xf32>
    %175 = arith.mulf %7, %174 : vector<16x128xf32>
    %cst_54 = arith.constant dense<0xFF800000> : vector<128xf32>
    %176 = vector.multi_reduction <maximumf>, %175, %cst_54 [0] : vector<16x128xf32> to vector<128xf32>
    %177 = vector.shape_cast %176 : vector<128xf32> to vector<1x128xf32>
    %178 = vector.broadcast %177 : vector<1x128xf32> to vector<16x128xf32>
    %179 = arith.subf %175, %178 : vector<16x128xf32>
    %180 = math.exp %179 : vector<16x128xf32>
    %cst_55 = arith.constant dense<0.000000e+00> : vector<128xf32>
    %181 = vector.multi_reduction <add>, %180, %cst_55 [0] : vector<16x128xf32> to vector<128xf32>
    %182 = vector.shape_cast %181 : vector<128xf32> to vector<1x128xf32>
    %183 = vector.broadcast %182 : vector<1x128xf32> to vector<16x128xf32>
    %184 = arith.divf %180, %183 : vector<16x128xf32>
    %185 = arith.mulf %1, %184 : vector<16x128xf32>
    %cst_56 = arith.constant dense<0.000000e+00> : vector<128xf32>
    %186 = vector.multi_reduction <add>, %185, %cst_56 [0] : vector<16x128xf32> to vector<128xf32>
    %187 = vector.shape_cast %186 : vector<128xf32> to vector<1x128xf32>
    %cst_57 = arith.constant 0.693147182 : f32
    %188 = vector.broadcast %cst_57 : f32 to vector<1x128xf32>
    %189 = arith.mulf %187, %188 : vector<1x128xf32>
    %190 = math.exp %189 : vector<1x128xf32>
    %cst_58 = arith.constant 0.315464884 : f32
    %191 = vector.broadcast %cst_58 : f32 to vector<1x128xf32>
    %192 = arith.mulf %190, %191 : vector<1x128xf32>
    %193 = arith.addf %169, %192 : vector<1x128xf32>
    %c0_59 = arith.constant 0 : index
    %c0_60 = arith.constant 0 : index
    %194 = vector.load %arg3[%c0_59, %c0_60] : memref<1x128xf32, #tpu.memory_space<vmem>>, vector<1x128xf32>
    %195 = arith.mulf %193, %194 : vector<1x128xf32>
    %c0_61 = arith.constant 0 : index
    %c0_62 = arith.constant 0 : index
    %196 = vector.load %arg4[%c0_61, %c0_62] : memref<1x128xf32, #tpu.memory_space<vmem>>, vector<1x128xf32>
    tpu.vector_store %arg4[%c0_61, %c0_62], %195 {strides = array<i32>} : memref<1x128xf32, #tpu.memory_space<vmem>>, vector<1x128xf32>,
    return
  }
  func.func @transform_0(%arg0: i32) -> (i32, i32) {
    %c0_i32 = arith.constant 0 : i32
    %c0_i32_0 = arith.constant 0 : i32
    return %c0_i32, %arg0 : i32, i32
  }
  func.func @transform_1(%arg0: i32) -> (i32, i32) {
    %c0_i32 = arith.constant 0 : i32
    %c0_i32_0 = arith.constant 0 : i32
    return %c0_i32, %arg0 : i32, i32
  }
  func.func @transform_2(%arg0: i32) -> (i32, i32) {
    %c0_i32 = arith.constant 0 : i32
    %c0_i32_0 = arith.constant 0 : i32
    return %c0_i32, %arg0 : i32, i32
  }
  func.func @transform_3(%arg0: i32) -> (i32, i32) {
    %c0_i32 = arith.constant 0 : i32
    %c0_i32_0 = arith.constant 0 : i32
    return %c0_i32, %arg0 : i32, i32
  }
}

</mosaic_0001>

<bundles_post_ra>
// kernel: neg.2
= control target key start
LH: loop header
LB: loop body
LE: loop exit
PB: predicated region body
PF: predicated region fallthrough
CT: control target
= control target key end

     0   :  { %s24_s0 = inlined_call_operand.vmem [shape: f32[4,16], index: 0, kind: input, shape index: {}]   ;;  %s25_s1 = inlined_call_operand.vmem [shape: f32[4,16], index: 1, kind: output, shape index: {}]  }
   0x1   :  { %v2_v0 = vld [vmem:[%s24_s0] sm:$0xf] }
   0x2   :  { %v5_v1 = vxor.u32 2147483648, %v2_v0 }
   0x4   :  { %7 = vst [vmem:[%s25_s1] sm:$0xf] %v5_v1 }

// kernel: listwise_smoothi_ndcgk_loss.1
= control target key start
LH: loop header
LB: loop body
LE: loop exit
PB: predicated region body
PF: predicated region fallthrough
CT: control target
= control target key end

     0   :  { %s543_s0 = inlined_call_operand.vmem [shape: f32[16,128], index: 0, kind: input, shape index: {}]   ;;  %s544_s1 = inlined_call_operand.vmem [shape: f32[16,128], index: 1, kind: input, shape index: {}]   ;;  %s545_s2 = inlined_call_operand.vmem [shape: f32[1,128], index: 2, kind: input, shape index: {}]   ;;  %s546_s3 = inlined_call_operand.vmem [shape: f32[1,128], index: 3, kind: output, shape index: {}]  }
   0x1   :  { %v14_v0 = vld [vmem:[%s543_s0] sm:$0xff]  ;;  %v15_v1 = vld [vmem:[%s543_s0 + $0x8] sm:$0xff] }
   0x2   :  { %v18_v2 = vmin.f32 %v14_v0, %v15_v1  ;;  %v500_v34 = vld [vmem:[%s544_s1] sm:$0xff]  ;;  %v505_v35 = vld [vmem:[%s544_s1 + $0x8] sm:$0xff] }
   0x4   :  { %v19_v3 = vrot.slane %v18_v2, 4 }
   0x6   :  { %v20_v4 = vmin.f32 %v18_v2, %v19_v3 }
   0x8   :  { %v21_v5 = vrot.slane %v20_v4, 2 }
   0xa   :  { %v22_v6 = vmin.f32 %v20_v4, %v21_v5 }
   0xc   :  { %v23_v7 = vrot.slane %v22_v6, 1 }
   0xe   :  { %v24_v8 = vmin.f32 %v22_v6, %v23_v7 }
  0x10   :  { %v25_v9 = vsub.f32 %v14_v0, %v24_v8  ;;  %v26_v10 = vsub.f32 %v15_v1, %v24_v8 }
  0x12   :  { %v489_v11 = vmul.f32 5.0, %v25_v9  ;;  %v491_v12 = vmul.f32 5.0, %v26_v10 }
  0x14   :  { %v29_v13 = vmax.f32 %v489_v11, %v491_v12 }
  0x16   :  { %v30_v14 = vrot.slane %v29_v13, 4 }
  0x18   :  { %v31_v15 = vmax.f32 %v29_v13, %v30_v14 }
  0x1a   :  { %v32_v16 = vrot.slane %v31_v15, 2 }
  0x1c   :  { %v33_v17 = vmax.f32 %v31_v15, %v32_v16 }
  0x1e   :  { %v34_v18 = vrot.slane %v33_v17, 1 }
  0x20   :  { %v35_v19 = vmax.f32 %v33_v17, %v34_v18 }
  0x22   :  { %v36_v20 = vsub.f32 %v489_v11, %v35_v19  ;;  %v37_v21 = vsub.f32 %v491_v12, %v35_v19 }
  0x24   :  { %v38_v22 = vmul.f32 1.442695, %v36_v20  ;;  %v40_v23 = vmul.f32 1.442695, %v37_v21 }
  0x26   :  { %399 = vpow2.f32 %v38_v22 }
  0x27   :  { %401 = vpow2.f32 %v40_v23 }
  0x33   :  { %v400_v24 = vpop.eup %399 }
  0x34   :  { %v402_v25 = vpop.eup %401 }
  0x35   :  { %v42_v26 = vadd.f32 %v402_v25, %v400_v24 }
  0x37   :  { %v43_v27 = vrot.slane %v42_v26, 4 }
  0x39   :  { %v44_v28 = vadd.f32 %v43_v27, %v42_v26 }
  0x3b   :  { %v45_v29 = vrot.slane %v44_v28, 2 }
  0x3d   :  { %v46_v30 = vadd.f32 %v45_v29, %v44_v28 }
  0x3f   :  { %v47_v31 = vrot.slane %v46_v30, 1 }
  0x41   :  { %v48_v32 = vadd.f32 %v47_v31, %v46_v30 }
  0x43   :  { %403 = vrcp.f32 %v48_v32 }
  0x50   :  { %v404_v33 = vpop.eup %403 }
  0x51   :  { %v50_v36 = vmul.f32 %v404_v33, %v400_v24  ;;  %v51_v37 = vmul.f32 %v404_v33, %v402_v25 }
  0x53   :  { %v52_v38 = vmul.f32 %v50_v36, %v500_v34  ;;  %v53_v39 = vmul.f32 %v51_v37, %v505_v35  ;;  %v65_v40 = vsub.f32 1.0, %v50_v36  ;;  %v66_v41 = vsub.f32 1.0, %v51_v37 }
  0x55   :  { %v54_v42 = vadd.f32 %v53_v39, %v52_v38  ;;  %v385_v43 = vadd.f32 -0.1, %v65_v40  ;;  %v386_v44 = vadd.f32 -0.1, %v66_v41 }
  0x57   :  { %v69_v45 = vmul.f32 %v385_v43, %v489_v11  ;;  %v70_v46 = vmul.f32 %v386_v44, %v491_v12  ;;  %v55_v3 = vrot.slane %v54_v42, 4 }
  0x59   :  { %v71_v47 = vmax.f32 %v69_v45, %v70_v46  ;;  %v56_v4 = vadd.f32 %v55_v3, %v54_v42 }
  0x5b   :  { %v72_v48 = vrot.slane %v71_v47, 4  ;;  %v57_v5 = vrot.slane %v56_v4, 2 }
  0x5d   :  { %v73_v49 = vmax.f32 %v71_v47, %v72_v48  ;;  %v58_v6 = vadd.f32 %v57_v5, %v56_v4 }
  0x5f   :  { %v74_v50 = vrot.slane %v73_v49, 2  ;;  %v59_v10 = vrot.slane %v58_v6, 1 }
  0x61   :  { %v75_v51 = vmax.f32 %v73_v49, %v74_v50  ;;  %v60_v20 = vadd.f32 %v59_v10, %v58_v6 }
  0x63   :  { %v76_v52 = vrot.slane %v75_v51, 1  ;;  %v61_v27 = vmul.f32 0.6931472, %v60_v20 }
  0x65   :  { %v77_v53 = vmax.f32 %v75_v51, %v76_v52  ;;  %v62_v32 = vmul.f32 1.442695, %v61_v27 }
  0x67   :  { %v78_v54 = vsub.f32 %v69_v45, %v77_v53  ;;  %v79_v55 = vsub.f32 %v70_v46, %v77_v53 }
  0x69   :  { %v80_v56 = vmul.f32 1.442695, %v78_v54  ;;  %v82_v57 = vmul.f32 1.442695, %v79_v55 }
  0x6b   :  { %405 = vpow2.f32 %v80_v56 }
  0x6c   :  { %407 = vpow2.f32 %v82_v57 }
  0x78   :  { %v406_v58 = vpop.eup %405 }
  0x79   :  { %v408_v59 = vpop.eup %407 }
  0x7a   :  { %v84_v60 = vadd.f32 %v408_v59, %v406_v58 }
  0x7c   :  { %v85_v61 = vrot.slane %v84_v60, 4 }
  0x7e   :  { %v86_v62 = vadd.f32 %v85_v61, %v84_v60 }
  0x80   :  { %v87_v63 = vrot.slane %v86_v62, 2 }
  0x82   :  { %v88_v0 = vadd.f32 %v87_v63, %v86_v62 }
  0x84   :  { %v89_v1 = vrot.slane %v88_v0, 1 }
  0x86   :  { %v90_v2 = vadd.f32 %v89_v1, %v88_v0 }
  0x88   :  { %409 = vrcp.f32 %v90_v2 }
  0x89   :  { %411 = vpow2.f32 %v62_v32 }
  0x95   :  { %v410_v7 = vpop.eup %409 }
  0x96   :  { %v92_v8 = vmul.f32 %v410_v7, %v406_v58  ;;  %v93_v9 = vmul.f32 %v410_v7, %v408_v59  ;;  %v412_v48 = vpop.eup %411 }
  0x97   :  { %v64_v49 = vadd.f32 2.220446e-16, %v412_v48 }
  0x98   :  { %v94_v13 = vmul.f32 %v92_v8, %v500_v34  ;;  %v95_v14 = vmul.f32 %v93_v9, %v505_v35  ;;  %v108_v15 = vsub.f32 1.0, %v92_v8  ;;  %v109_v16 = vsub.f32 1.0, %v93_v9 }
  0x9a   :  { %v96_v17 = vadd.f32 %v95_v14, %v94_v13  ;;  %v387_v18 = vadd.f32 -0.1, %v108_v15  ;;  %v388_v19 = vadd.f32 -0.1, %v109_v16 }
  0x9c   :  { %v97_v21 = vrot.slane %v96_v17, 4  ;;  %v112_v22 = vmul.f32 %v387_v18, %v385_v43  ;;  %v113_v23 = vmul.f32 %v388_v19, %v386_v44 }
  0x9e   :  { %v98_v24 = vadd.f32 %v97_v21, %v96_v17  ;;  %v114_v25 = vmul.f32 %v112_v22, %v489_v11  ;;  %v115_v26 = vmul.f32 %v113_v23, %v491_v12 }
  0xa0   :  { %v99_v28 = vrot.slane %v98_v24, 2  ;;  %v116_v29 = vmax.f32 %v114_v25, %v115_v26 }
  0xa2   :  { %v100_v30 = vadd.f32 %v99_v28, %v98_v24  ;;  %v117_v31 = vrot.slane %v116_v29, 4 }
  0xa4   :  { %v101_v33 = vrot.slane %v100_v30, 1  ;;  %v118_v36 = vmax.f32 %v116_v29, %v117_v31 }
  0xa6   :  { %v102_v37 = vadd.f32 %v101_v33, %v100_v30  ;;  %v119_v38 = vrot.slane %v118_v36, 2 }
  0xa8   :  { %v103_v39 = vmul.f32 0.6931472, %v102_v37  ;;  %v120_v40 = vmax.f32 %v118_v36, %v119_v38 }
  0xaa   :  { %v104_v41 = vmul.f32 1.442695, %v103_v39  ;;  %v121_v42 = vrot.slane %v120_v40, 1 }
  0xac   :  { %413 = vpow2.f32 %v104_v41  ;;  %v122_v43 = vmax.f32 %v120_v40, %v121_v42 }
  0xae   :  { %v123_v44 = vsub.f32 %v114_v25, %v122_v43  ;;  %v124_v45 = vsub.f32 %v115_v26, %v122_v43 }
  0xb0   :  { %v125_v46 = vmul.f32 1.442695, %v123_v44  ;;  %v127_v47 = vmul.f32 1.442695, %v124_v45 }
  0xb2   :  { %415 = vpow2.f32 %v125_v46 }
  0xb3   :  { %417 = vpow2.f32 %v127_v47 }
  0xb9   :  { %v414_v50 = vpop.eup %413 }
  0xba   :  { %v106_v51 = vmul.f32 0.63092977, %v414_v50 }
  0xbc   :  { %v107_v52 = vadd.f32 %v106_v51, %v64_v49 }
  0xbf   :  { %v416_v53 = vpop.eup %415 }
  0xc0   :  { %v418_v54 = vpop.eup %417 }
  0xc1   :  { %v129_v55 = vadd.f32 %v418_v54, %v416_v53 }
  0xc3   :  { %v130_v56 = vrot.slane %v129_v55, 4 }
  0xc5   :  { %v131_v57 = vadd.f32 %v130_v56, %v129_v55 }
  0xc7   :  { %v132_v58 = vrot.slane %v131_v57, 2 }
  0xc9   :  { %v133_v59 = vadd.f32 %v132_v58, %v131_v57 }
  0xcb   :  { %v134_v60 = vrot.slane %v133_v59, 1 }
  0xcd   :  { %v135_v61 = vadd.f32 %v134_v60, %v133_v59 }
  0xcf   :  { %419 = vrcp.f32 %v135_v61 }
  0xdc   :  { %v420_v62 = vpop.eup %419 }
  0xdd   :  { %v137_v63 = vmul.f32 %v420_v62, %v416_v53  ;;  %v138_v0 = vmul.f32 %v420_v62, %v418_v54 }
  0xdf   :  { %v139_v1 = vmul.f32 %v137_v63, %v500_v34  ;;  %v140_v2 = vmul.f32 %v138_v0, %v505_v35  ;;  %v153_v3 = vsub.f32 1.0, %v137_v63  ;;  %v154_v4 = vsub.f32 1.0, %v138_v0 }
  0xe1   :  { %v141_v5 = vadd.f32 %v140_v2, %v139_v1  ;;  %v389_v6 = vadd.f32 -0.1, %v153_v3  ;;  %v390_v7 = vadd.f32 -0.1, %v154_v4 }
  0xe3   :  { %v142_v8 = vrot.slane %v141_v5, 4  ;;  %v157_v9 = vmul.f32 %v389_v6, %v112_v22  ;;  %v158_v10 = vmul.f32 %v390_v7, %v113_v23 }
  0xe5   :  { %v143_v13 = vadd.f32 %v142_v8, %v141_v5  ;;  %v159_v14 = vmul.f32 %v157_v9, %v489_v11  ;;  %v160_v15 = vmul.f32 %v158_v10, %v491_v12 }
  0xe7   :  { %v144_v16 = vrot.slane %v143_v13, 2  ;;  %v161_v17 = vmax.f32 %v159_v14, %v160_v15 }
  0xe9   :  { %v145_v18 = vadd.f32 %v144_v16, %v143_v13  ;;  %v162_v19 = vrot.slane %v161_v17, 4 }
  0xeb   :  { %v146_v20 = vrot.slane %v145_v18, 1  ;;  %v163_v21 = vmax.f32 %v161_v17, %v162_v19 }
  0xed   :  { %v147_v24 = vadd.f32 %v146_v20, %v145_v18  ;;  %v164_v25 = vrot.slane %v163_v21, 2 }
  0xef   :  { %v148_v26 = vmul.f32 0.6931472, %v147_v24  ;;  %v165_v27 = vmax.f32 %v163_v21, %v164_v25 }
  0xf1   :  { %v149_v28 = vmul.f32 1.442695, %v148_v26  ;;  %v166_v29 = vrot.slane %v165_v27, 1 }
  0xf3   :  { %421 = vpow2.f32 %v149_v28  ;;  %v167_v22 = vmax.f32 %v165_v27, %v166_v29 }
  0xf5   :  { %v168_v23 = vsub.f32 %v159_v14, %v167_v22  ;;  %v169_v30 = vsub.f32 %v160_v15, %v167_v22 }
  0xf7   :  { %v170_v31 = vmul.f32 1.442695, %v168_v23  ;;  %v172_v32 = vmul.f32 1.442695, %v169_v30 }
  0xf9   :  { %423 = vpow2.f32 %v170_v31 }
  0xfa   :  { %425 = vpow2.f32 %v172_v32 }
 0x100   :  { %v422_v33 = vpop.eup %421 }
 0x101   :  { %v151_v36 = vmul.f32 0.5, %v422_v33 }
 0x103   :  { %v152_v37 = vadd.f32 %v151_v36, %v107_v52 }
 0x106   :  { %v424_v38 = vpop.eup %423 }
 0x107   :  { %v426_v39 = vpop.eup %425 }
 0x108   :  { %v174_v40 = vadd.f32 %v426_v39, %v424_v38 }
 0x10a   :  { %v175_v41 = vrot.slane %v174_v40, 4 }
 0x10c   :  { %v176_v42 = vadd.f32 %v175_v41, %v174_v40 }
 0x10e   :  { %v177_v43 = vrot.slane %v176_v42, 2 }
 0x110   :  { %v178_v44 = vadd.f32 %v177_v43, %v176_v42 }
 0x112   :  { %v179_v45 = vrot.slane %v178_v44, 1 }
 0x114   :  { %v180_v46 = vadd.f32 %v179_v45, %v178_v44 }
 0x116   :  { %427 = vrcp.f32 %v180_v46 }
 0x123   :  { %v428_v47 = vpop.eup %427 }
 0x124   :  { %v182_v48 = vmul.f32 %v428_v47, %v424_v38  ;;  %v183_v49 = vmul.f32 %v428_v47, %v426_v39 }
 0x126   :  { %v184_v50 = vmul.f32 %v182_v48, %v500_v34  ;;  %v185_v51 = vmul.f32 %v183_v49, %v505_v35  ;;  %v198_v53 = vsub.f32 1.0, %v182_v48  ;;  %v199_v54 = vsub.f32 1.0, %v183_v49 }
 0x128   :  { %v186_v52 = vadd.f32 %v185_v51, %v184_v50  ;;  %v391_v55 = vadd.f32 -0.1, %v198_v53  ;;  %v392_v56 = vadd.f32 -0.1, %v199_v54 }
 0x12a   :  { %v187_v57 = vrot.slane %v186_v52, 4  ;;  %v202_v58 = vmul.f32 %v391_v55, %v157_v9  ;;  %v203_v59 = vmul.f32 %v392_v56, %v158_v10 }
 0x12c   :  { %v188_v60 = vadd.f32 %v187_v57, %v186_v52  ;;  %v204_v61 = vmul.f32 %v202_v58, %v489_v11  ;;  %v205_v62 = vmul.f32 %v203_v59, %v491_v12 }
 0x12e   :  { %v189_v63 = vrot.slane %v188_v60, 2  ;;  %v206_v0 = vmax.f32 %v204_v61, %v205_v62 }
 0x130   :  { %v190_v1 = vadd.f32 %v189_v63, %v188_v60  ;;  %v207_v2 = vrot.slane %v206_v0, 4 }
 0x132   :  { %v191_v3 = vrot.slane %v190_v1, 1  ;;  %v208_v4 = vmax.f32 %v206_v0, %v207_v2 }
 0x134   :  { %v192_v5 = vadd.f32 %v191_v3, %v190_v1  ;;  %v209_v6 = vrot.slane %v208_v4, 2 }
 0x136   :  { %v193_v7 = vmul.f32 0.6931472, %v192_v5  ;;  %v210_v8 = vmax.f32 %v208_v4, %v209_v6 }
 0x138   :  { %v194_v13 = vmul.f32 1.442695, %v193_v7  ;;  %v211_v14 = vrot.slane %v210_v8, 1 }
 0x13a   :  { %429 = vpow2.f32 %v194_v13  ;;  %v212_v9 = vmax.f32 %v210_v8, %v211_v14 }
 0x13c   :  { %v213_v10 = vsub.f32 %v204_v61, %v212_v9  ;;  %v214_v15 = vsub.f32 %v205_v62, %v212_v9 }
 0x13e   :  { %v215_v16 = vmul.f32 1.442695, %v213_v10  ;;  %v217_v17 = vmul.f32 1.442695, %v214_v15 }
 0x140   :  { %431 = vpow2.f32 %v215_v16 }
 0x141   :  { %433 = vpow2.f32 %v217_v17 }
 0x147   :  { %v430_v18 = vpop.eup %429 }
 0x148   :  { %v196_v19 = vmul.f32 0.43067655, %v430_v18 }
 0x14a   :  { %v197_v20 = vadd.f32 %v196_v19, %v152_v37 }
 0x14d   :  { %v432_v21 = vpop.eup %431 }
 0x14e   :  { %v434_v24 = vpop.eup %433 }
 0x14f   :  { %v219_v25 = vadd.f32 %v434_v24, %v432_v21 }
 0x151   :  { %v220_v26 = vrot.slane %v219_v25, 4 }
 0x153   :  { %v221_v27 = vadd.f32 %v220_v26, %v219_v25 }
 0x155   :  { %v222_v28 = vrot.slane %v221_v27, 2 }
 0x157   :  { %v223_v29 = vadd.f32 %v222_v28, %v221_v27 }
 0x159   :  { %v224_v22 = vrot.slane %v223_v29, 1 }
 0x15b   :  { %v225_v23 = vadd.f32 %v224_v22, %v223_v29 }
 0x15d   :  { %435 = vrcp.f32 %v225_v23 }
 0x16a   :  { %v436_v30 = vpop.eup %435 }
 0x16b   :  { %v227_v31 = vmul.f32 %v436_v30, %v432_v21  ;;  %v228_v32 = vmul.f32 %v436_v30, %v434_v24 }
 0x16d   :  { %v229_v33 = vmul.f32 %v227_v31, %v500_v34  ;;  %v230_v36 = vmul.f32 %v228_v32, %v505_v35  ;;  %v243_v38 = vsub.f32 1.0, %v227_v31  ;;  %v244_v39 = vsub.f32 1.0, %v228_v32 }
 0x16f   :  { %v231_v37 = vadd.f32 %v230_v36, %v229_v33  ;;  %v393_v40 = vadd.f32 -0.1, %v243_v38  ;;  %v394_v41 = vadd.f32 -0.1, %v244_v39 }
 0x171   :  { %v232_v42 = vrot.slane %v231_v37, 4  ;;  %v247_v43 = vmul.f32 %v393_v40, %v202_v58  ;;  %v248_v44 = vmul.f32 %v394_v41, %v203_v59 }
 0x173   :  { %v233_v45 = vadd.f32 %v232_v42, %v231_v37  ;;  %v249_v46 = vmul.f32 %v247_v43, %v489_v11  ;;  %v250_v47 = vmul.f32 %v248_v44, %v491_v12 }
 0x175   :  { %v234_v48 = vrot.slane %v233_v45, 2  ;;  %v251_v49 = vmax.f32 %v249_v46, %v250_v47 }
 0x177   :  { %v235_v50 = vadd.f32 %v234_v48, %v233_v45  ;;  %v252_v51 = vrot.slane %v251_v49, 4 }
 0x179   :  { %v236_v53 = vrot.slane %v235_v50, 1  ;;  %v253_v54 = vmax.f32 %v251_v49, %v252_v51 }
 0x17b   :  { %v237_v52 = vadd.f32 %v236_v53, %v235_v50  ;;  %v254_v55 = vrot.slane %v253_v54, 2 }
 0x17d   :  { %v238_v56 = vmul.f32 0.6931472, %v237_v52  ;;  %v255_v57 = vmax.f32 %v253_v54, %v254_v55 }
 0x17f   :  { %v239_v60 = vmul.f32 1.442695, %v238_v56  ;;  %v256_v61 = vrot.slane %v255_v57, 1 }
 0x181   :  { %437 = vpow2.f32 %v239_v60  ;;  %v257_v58 = vmax.f32 %v255_v57, %v256_v61 }
 0x183   :  { %v258_v59 = vsub.f32 %v249_v46, %v257_v58  ;;  %v259_v62 = vsub.f32 %v250_v47, %v257_v58 }
 0x185   :  { %v260_v63 = vmul.f32 1.442695, %v258_v59  ;;  %v262_v0 = vmul.f32 1.442695, %v259_v62 }
 0x187   :  { %439 = vpow2.f32 %v260_v63 }
 0x188   :  { %441 = vpow2.f32 %v262_v0 }
 0x18e   :  { %v438_v1 = vpop.eup %437 }
 0x18f   :  { %v241_v2 = vmul.f32 0.3868528, %v438_v1 }
 0x191   :  { %v242_v3 = vadd.f32 %v241_v2, %v197_v20 }
 0x194   :  { %v440_v4 = vpop.eup %439 }
 0x195   :  { %v442_v5 = vpop.eup %441 }
 0x196   :  { %v264_v6 = vadd.f32 %v442_v5, %v440_v4 }
 0x198   :  { %v265_v7 = vrot.slane %v264_v6, 4 }
 0x19a   :  { %v266_v8 = vadd.f32 %v265_v7, %v264_v6 }
 0x19c   :  { %v267_v13 = vrot.slane %v266_v8, 2 }
 0x19e   :  { %v268_v14 = vadd.f32 %v267_v13, %v266_v8 }
 0x1a0   :  { %v269_v9 = vrot.slane %v268_v14, 1 }
 0x1a2   :  { %v270_v10 = vadd.f32 %v269_v9, %v268_v14 }
 0x1a4   :  { %443 = vrcp.f32 %v270_v10 }
 0x1b1   :  { %v444_v15 = vpop.eup %443 }
 0x1b2   :  { %v272_v16 = vmul.f32 %v444_v15, %v440_v4  ;;  %v273_v17 = vmul.f32 %v444_v15, %v442_v5 }
 0x1b4   :  { %v274_v18 = vmul.f32 %v272_v16, %v500_v34  ;;  %v275_v19 = vmul.f32 %v273_v17, %v505_v35  ;;  %v288_v21 = vsub.f32 1.0, %v272_v16  ;;  %v289_v24 = vsub.f32 1.0, %v273_v17 }
 0x1b6   :  { %v276_v20 = vadd.f32 %v275_v19, %v274_v18  ;;  %v395_v25 = vadd.f32 -0.1, %v288_v21  ;;  %v396_v26 = vadd.f32 -0.1, %v289_v24 }
 0x1b8   :  { %v277_v27 = vrot.slane %v276_v20, 4  ;;  %v292_v28 = vmul.f32 %v395_v25, %v247_v43  ;;  %v293_v29 = vmul.f32 %v396_v26, %v248_v44 }
 0x1ba   :  { %v278_v22 = vadd.f32 %v277_v27, %v276_v20  ;;  %v294_v23 = vmul.f32 %v292_v28, %v489_v11  ;;  %v295_v30 = vmul.f32 %v293_v29, %v491_v12 }
 0x1bc   :  { %v279_v31 = vrot.slane %v278_v22, 2  ;;  %v296_v32 = vmax.f32 %v294_v23, %v295_v30 }
 0x1be   :  { %v280_v33 = vadd.f32 %v279_v31, %v278_v22  ;;  %v297_v36 = vrot.slane %v296_v32, 4 }
 0x1c0   :  { %v281_v38 = vrot.slane %v280_v33, 1  ;;  %v298_v39 = vmax.f32 %v296_v32, %v297_v36 }
 0x1c2   :  { %v282_v37 = vadd.f32 %v281_v38, %v280_v33  ;;  %v299_v40 = vrot.slane %v298_v39, 2 }
 0x1c4   :  { %v283_v41 = vmul.f32 0.6931472, %v282_v37  ;;  %v300_v42 = vmax.f32 %v298_v39, %v299_v40 }
 0x1c6   :  { %v284_v45 = vmul.f32 1.442695, %v283_v41  ;;  %v301_v46 = vrot.slane %v300_v42, 1 }
 0x1c8   :  { %445 = vpow2.f32 %v284_v45  ;;  %v302_v43 = vmax.f32 %v300_v42, %v301_v46 }
 0x1ca   :  { %v303_v44 = vsub.f32 %v294_v23, %v302_v43  ;;  %v304_v47 = vsub.f32 %v295_v30, %v302_v43 }
 0x1cc   :  { %v305_v48 = vmul.f32 1.442695, %v303_v44  ;;  %v307_v49 = vmul.f32 1.442695, %v304_v47 }
 0x1ce   :  { %447 = vpow2.f32 %v305_v48 }
 0x1cf   :  { %449 = vpow2.f32 %v307_v49 }
 0x1d5   :  { %v446_v50 = vpop.eup %445 }
 0x1d6   :  { %v286_v51 = vmul.f32 0.3562072, %v446_v50 }
 0x1d8   :  { %v287_v53 = vadd.f32 %v286_v51, %v242_v3 }
 0x1db   :  { %v448_v54 = vpop.eup %447 }
 0x1dc   :  { %v450_v52 = vpop.eup %449 }
 0x1dd   :  { %v309_v55 = vadd.f32 %v450_v52, %v448_v54 }
 0x1df   :  { %v310_v56 = vrot.slane %v309_v55, 4 }
 0x1e1   :  { %v311_v57 = vadd.f32 %v310_v56, %v309_v55 }
 0x1e3   :  { %v312_v60 = vrot.slane %v311_v57, 2 }
 0x1e5   :  { %v313_v61 = vadd.f32 %v312_v60, %v311_v57 }
 0x1e7   :  { %v314_v58 = vrot.slane %v313_v61, 1 }
 0x1e9   :  { %v315_v59 = vadd.f32 %v314_v58, %v313_v61 }
 0x1eb   :  { %451 = vrcp.f32 %v315_v59  ;;  %v378_v59 = vld [vmem:[%s545_s2] sm:$0x1] }
 0x1f8   :  { %v452_v62 = vpop.eup %451 }
 0x1f9   :  { %v317_v63 = vmul.f32 %v452_v62, %v448_v54  ;;  %v318_v0 = vmul.f32 %v452_v62, %v450_v52 }
 0x1fb   :  { %v319_v1 = vmul.f32 %v317_v63, %v500_v34  ;;  %v320_v2 = vmul.f32 %v318_v0, %v505_v35  ;;  %v333_v4 = vsub.f32 1.0, %v317_v63  ;;  %v334_v5 = vsub.f32 1.0, %v318_v0 }
 0x1fd   :  { %v321_v3 = vadd.f32 %v320_v2, %v319_v1  ;;  %v397_v6 = vadd.f32 -0.1, %v333_v4  ;;  %v398_v7 = vadd.f32 -0.1, %v334_v5 }
 0x1ff   :  { %v322_v8 = vrot.slane %v321_v3, 4  ;;  %v337_v13 = vmul.f32 %v397_v6, %v292_v28  ;;  %v338_v14 = vmul.f32 %v398_v7, %v293_v29 }
 0x201   :  { %v323_v9 = vadd.f32 %v322_v8, %v321_v3  ;;  %v339_v10 = vmul.f32 %v337_v13, %v489_v11  ;;  %v340_v15 = vmul.f32 %v338_v14, %v491_v12 }
 0x203   :  { %v324_v16 = vrot.slane %v323_v9, 2  ;;  %v341_v17 = vmax.f32 %v339_v10, %v340_v15 }
 0x205   :  { %v325_v18 = vadd.f32 %v324_v16, %v323_v9  ;;  %v342_v19 = vrot.slane %v341_v17, 4 }
 0x207   :  { %v326_v21 = vrot.slane %v325_v18, 1  ;;  %v343_v24 = vmax.f32 %v341_v17, %v342_v19 }
 0x209   :  { %v327_v20 = vadd.f32 %v326_v21, %v325_v18  ;;  %v344_v25 = vrot.slane %v343_v24, 2 }
 0x20b   :  { %v328_v26 = vmul.f32 0.6931472, %v327_v20  ;;  %v345_v27 = vmax.f32 %v343_v24, %v344_v25 }
 0x20d   :  { %v329_v22 = vmul.f32 1.442695, %v328_v26  ;;  %v346_v23 = vrot.slane %v345_v27, 1 }
 0x20f   :  { %453 = vpow2.f32 %v329_v22  ;;  %v347_v28 = vmax.f32 %v345_v27, %v346_v23 }
 0x211   :  { %v348_v29 = vsub.f32 %v339_v10, %v347_v28  ;;  %v349_v30 = vsub.f32 %v340_v15, %v347_v28 }
 0x213   :  { %v350_v31 = vmul.f32 1.442695, %v348_v29  ;;  %v352_v11 = vmul.f32 1.442695, %v349_v30 }
 0x215   :  { %455 = vpow2.f32 %v350_v31 }
 0x216   :  { %457 = vpow2.f32 %v352_v11 }
 0x21c   :  { %v454_v12 = vpop.eup %453 }
 0x21d   :  { %v331_v32 = vmul.f32 0.33333334, %v454_v12 }
 0x21f   :  { %v332_v33 = vadd.f32 %v331_v32, %v287_v53 }
 0x222   :  { %v456_v36 = vpop.eup %455 }
 0x223   :  { %v458_v38 = vpop.eup %457 }
 0x224   :  { %v354_v39 = vadd.f32 %v458_v38, %v456_v36 }
 0x226   :  { %v355_v37 = vrot.slane %v354_v39, 4 }
 0x228   :  { %v356_v40 = vadd.f32 %v355_v37, %v354_v39 }
 0x22a   :  { %v357_v41 = vrot.slane %v356_v40, 2 }
 0x22c   :  { %v358_v42 = vadd.f32 %v357_v41, %v356_v40 }
 0x22e   :  { %v359_v45 = vrot.slane %v358_v42, 1 }
 0x230   :  { %v360_v46 = vadd.f32 %v359_v45, %v358_v42 }
 0x232   :  { %459 = vrcp.f32 %v360_v46 }
 0x23f   :  { %v460_v43 = vpop.eup %459 }
 0x240   :  { %v362_v44 = vmul.f32 %v460_v43, %v456_v36  ;;  %v363_v47 = vmul.f32 %v460_v43, %v458_v38 }
 0x242   :  { %v364_v48 = vmul.f32 %v362_v44, %v500_v34  ;;  %v365_v49 = vmul.f32 %v363_v47, %v505_v35 }
 0x244   :  { %v366_v50 = vadd.f32 %v365_v49, %v364_v48 }
 0x246   :  { %v367_v51 = vrot.slane %v366_v50, 4 }
 0x248   :  { %v368_v53 = vadd.f32 %v367_v51, %v366_v50 }
 0x24a   :  { %v369_v54 = vrot.slane %v368_v53, 2 }
 0x24c   :  { %v370_v52 = vadd.f32 %v369_v54, %v368_v53 }
 0x24e   :  { %v371_v55 = vrot.slane %v370_v52, 1 }
 0x250   :  { %v372_v56 = vadd.f32 %v371_v55, %v370_v52 }
 0x252   :  { %v373_v57 = vmul.f32 0.6931472, %v372_v56 }
 0x254   :  { %v374_v60 = vmul.f32 1.442695, %v373_v57 }
 0x256   :  { %461 = vpow2.f32 %v374_v60 }
 0x263   :  { %v462_v61 = vpop.eup %461 }
 0x264   :  { %v376_v58 = vmul.f32 0.31546488, %v462_v61 }
 0x266   :  { %v377_v62 = vadd.f32 %v376_v58, %v332_v33 }
 0x268   :  { %v379_v34 = vmul.f32 %v378_v59, %v377_v62 }
 0x26a   :  { %380 = vst [vmem:[%s546_s3] sm:$0x1] %v379_v34 }

</bundles_post_ra>
